<compile_context>
chip_gen: v7x
topology: tpu7x:2x2x1
jax: 0.10.0
libtpu: 0.0.40
codegen_flags: <defaults>
</compile_context>

<pallas_src>
import jax
import jax.numpy as jnp
from jax.experimental import pallas as pl
from jax.experimental.pallas import tpu as pltpu


def _round_up(n, m):
    return ((n + m - 1) // m) * m


def _mlp_kernel(x_ref, w1_ref, b1_ref, w2_ref, b2_ref, ot_ref):
    # One (TB, 13) batch tile: two matmuls + bias + ReLU entirely in VMEM.
    x = x_ref[...]                                                      # (TB, 13)
    h = jnp.dot(x, w1_ref[...], preferred_element_type=jnp.float32,
                precision=jax.lax.Precision.HIGHEST)                    # (TB, 64)
    h = jnp.maximum(h + b1_ref[...], 0.0)                               # bias + ReLU
    y = jnp.dot(h, w2_ref[...], preferred_element_type=jnp.float32,
                precision=jax.lax.Precision.HIGHEST)                    # (TB, 3)
    y = y + b2_ref[...]
    # Store transposed: (3, TB) is lane-dense -> unmasked stores, dense HBM
    # writeback. The (TB, 3) -> (3, TB) transpose is a cheap XLU op hidden
    # under the output DMA.
    ot_ref[...] = y.T.astype(ot_ref.dtype)


def audio_classifier_forward(x, w1, b1, w2, b2, *, tb=8192):
    """x: (B, 13) float32 -> (B, 3) float32."""
    B, K = x.shape
    H = w1.shape[1]
    N = w2.shape[1]

    # Batch tile: multiple of 128 so the transposed (N, tb) output block is
    # lane-aligned; shrink for small batches. No full-array padding -- the
    # ragged final block is handled by Pallas's masked boundary DMA.
    tb = max(128, min(_round_up(tb, 128), _round_up(B, 128)))
    grid = (pl.cdiv(B, tb),)

    weight_bytes = (w1.size + b1.size + w2.size + b2.size) * 4
    cost = pl.CostEstimate(
        flops=2 * B * (K * H + H * N),
        transcendentals=0,
        bytes_accessed=B * (K + N) * 4 + weight_bytes,
    )

    out_t = pl.pallas_call(
        _mlp_kernel,
        out_shape=jax.ShapeDtypeStruct((N, B), jnp.float32),
        grid=grid,
        in_specs=[
            # Batch-tiled input: streamed / double-buffered by Pallas.
            pl.BlockSpec((tb, K), lambda i: (i, 0)),
            # Weights & biases: constant index map -> VMEM-resident.
            pl.BlockSpec((K, H), lambda i: (0, 0)),
            pl.BlockSpec((1, H), lambda i: (0, 0)),
            pl.BlockSpec((H, N), lambda i: (0, 0)),
            pl.BlockSpec((1, N), lambda i: (0, 0)),
        ],
        # Lane-dense transposed output: (N, tb) blocks along the batch axis.
        out_specs=pl.BlockSpec((N, tb), lambda i: (0, i)),
        compiler_params=pltpu.CompilerParams(
            dimension_semantics=("parallel",),
            vmem_limit_bytes=48 * 1024 * 1024,
        ),
        cost_estimate=cost,
    )(x, w1, b1, w2, b2)

    # (3, B) -> (B, 3): negligible traffic (N * B floats).
    return out_t.T


def init_params(key):
    """Deterministic init matching nn.Linear shapes (stored transposed)."""
    k1, k2, k3, k4 = jax.random.split(key, 4)
    # PyTorch default init: U(-1/sqrt(fan_in), 1/sqrt(fan_in))
    lim1 = 1.0 / jnp.sqrt(13.0)
    lim2 = 1.0 / jnp.sqrt(64.0)
    w1 = jax.random.uniform(k1, (13, 64), jnp.float32, -lim1, lim1)
    b1 = jax.random.uniform(k2, (1, 64), jnp.float32, -lim1, lim1)
    w2 = jax.random.uniform(k3, (64, 3), jnp.float32, -lim2, lim2)
    b2 = jax.random.uniform(k4, (1, 3), jnp.float32, -lim2, lim2)
    return w1, b1, w2, b2


def _reference(x, w1, b1, w2, b2):
    h = jnp.maximum(
        jnp.dot(x, w1, precision=jax.lax.Precision.HIGHEST) + b1, 0.0)
    return jnp.dot(h, w2, precision=jax.lax.Precision.HIGHEST) + b2


if __name__ == "__main__":
    key = jax.random.PRNGKey(0)
    kx, kp, kx2 = jax.random.split(key, 3)
    w1, b1, w2, b2 = init_params(kp)

    # Small demo batch (13 MFCC features per example).
    batch = 8
    x = jax.random.normal(kx, (batch, 13), jnp.float32)
    out = jax.block_until_ready(audio_classifier_forward(x, w1, b1, w2, b2))
    ref = _reference(x, w1, b1, w2, b2)
    assert out.shape == (batch, 3)
    assert jnp.allclose(out, ref, atol=1e-5, rtol=1e-5)

    # Ragged, multi-tile batch to exercise the cdiv grid + masked final block.
    batch2 = 301
    x2 = jax.random.normal(kx2, (batch2, 13), jnp.float32)
    out2 = jax.block_until_ready(
        audio_classifier_forward(x2, w1, b1, w2, b2, tb=128)
    )
    ref2 = _reference(x2, w1, b1, w2, b2)
    assert out2.shape == (batch2, 3)
    assert jnp.allclose(out2, ref2, atol=1e-5, rtol=1e-5)

    print("KERNEL_OK")
</pallas_src>

<mosaic_0001>
module attributes {stable_mosaic.version = 11 : i64} {
  func.func @_mlp_kernel(%arg0: i32, %arg1: memref<128x13xf32, #tpu.memory_space<vmem>>, %arg2: memref<13x64xf32, #tpu.memory_space<vmem>>, %arg3: memref<1x64xf32, #tpu.memory_space<vmem>>, %arg4: memref<64x3xf32, #tpu.memory_space<vmem>>, %arg5: memref<1x3xf32, #tpu.memory_space<vmem>>, %arg6: memref<3x128xf32, #tpu.memory_space<vmem>>) attributes {dimension_semantics = [#tpu.dimension_semantics<parallel>], iteration_bounds = array<i64: 1>, scalar_prefetch = 0 : i64, scratch_operands = 0 : i64, tpu.core_type = #tpu.core_type<tc>, window_params = [{transform_indices = @transform_0, window_bounds = array<i64: 128, 13>}, {pipeline_mode = #tpu.pipeline_mode<synchronous>, transform_indices = @transform_1, window_bounds = array<i64: 13, 64>}, {pipeline_mode = #tpu.pipeline_mode<synchronous>, transform_indices = @transform_2, window_bounds = array<i64: 1, 64>}, {pipeline_mode = #tpu.pipeline_mode<synchronous>, transform_indices = @transform_3, window_bounds = array<i64: 64, 3>}, {pipeline_mode = #tpu.pipeline_mode<synchronous>, transform_indices = @transform_4, window_bounds = array<i64: 1, 3>}, {transform_indices = @transform_5, window_bounds = array<i64: 3, 128>}]} {
    %c0 = arith.constant 0 : index
    %c0_0 = arith.constant 0 : index
    %0 = vector.load %arg1[%c0, %c0_0] : memref<128x13xf32, #tpu.memory_space<vmem>>, vector<128x13xf32>
    %c0_1 = arith.constant 0 : index
    %c0_2 = arith.constant 0 : index
    %1 = vector.load %arg2[%c0_1, %c0_2] : memref<13x64xf32, #tpu.memory_space<vmem>>, vector<13x64xf32>
    %cst = arith.constant dense<0.000000e+00> : vector<128x64xf32>
    %2 = tpu.matmul %0, %1, %cst {dimension_numbers = #tpu.dot_dimension_numbers<[1], [0], [0], [1], [0, 0, 1, 1], [], []>, precision = #tpu.contract_precision<fp32>} : vector<128x13xf32>, vector<13x64xf32>, vector<128x64xf32> -> vector<128x64xf32>
    %c0_3 = arith.constant 0 : index
    %c0_4 = arith.constant 0 : index
    %3 = vector.load %arg3[%c0_3, %c0_4] : memref<1x64xf32, #tpu.memory_space<vmem>>, vector<1x64xf32>
    %4 = vector.broadcast %3 : vector<1x64xf32> to vector<128x64xf32>
    %5 = arith.addf %2, %4 : vector<128x64xf32>
    %cst_5 = arith.constant 0.000000e+00 : f32
    %6 = vector.broadcast %cst_5 : f32 to vector<128x64xf32>
    %7 = arith.maximumf %5, %6 : vector<128x64xf32>
    %c0_6 = arith.constant 0 : index
    %c0_7 = arith.constant 0 : index
    %8 = vector.load %arg4[%c0_6, %c0_7] : memref<64x3xf32, #tpu.memory_space<vmem>>, vector<64x3xf32>
    %cst_8 = arith.constant dense<0.000000e+00> : vector<128x3xf32>
    %9 = tpu.matmul %7, %8, %cst_8 {dimension_numbers = #tpu.dot_dimension_numbers<[1], [0], [0], [1], [0, 0, 1, 1], [], []>, precision = #tpu.contract_precision<fp32>} : vector<128x64xf32>, vector<64x3xf32>, vector<128x3xf32> -> vector<128x3xf32>
    %c0_9 = arith.constant 0 : index
    %c0_10 = arith.constant 0 : index
    %10 = vector.load %arg5[%c0_9, %c0_10] : memref<1x3xf32, #tpu.memory_space<vmem>>, vector<1x3xf32>
    %11 = vector.broadcast %10 : vector<1x3xf32> to vector<128x3xf32>
    %12 = arith.addf %9, %11 : vector<128x3xf32>
    %13 = tpu.transpose %12, [1, 0] : vector<128x3xf32> -> vector<3x128xf32>
    %c0_11 = arith.constant 0 : index
    %c0_12 = arith.constant 0 : index
    %14 = vector.load %arg6[%c0_11, %c0_12] : memref<3x128xf32, #tpu.memory_space<vmem>>, vector<3x128xf32>
    tpu.vector_store %arg6[%c0_11, %c0_12], %13 {strides = array<i32>} : memref<3x128xf32, #tpu.memory_space<vmem>>, vector<3x128xf32>,
    return
  }
  func.func @transform_0(%arg0: i32) -> (i32, i32) {
    %c0_i32 = arith.constant 0 : i32
    %c0_i32_0 = arith.constant 0 : i32
    return %arg0, %c0_i32 : i32, i32
  }
  func.func @transform_1(%arg0: i32) -> (i32, i32) {
    %c0_i32 = arith.constant 0 : i32
    %c0_i32_0 = arith.constant 0 : i32
    %c0_i32_1 = arith.constant 0 : i32
    return %c0_i32, %c0_i32_0 : i32, i32
  }
  func.func @transform_2(%arg0: i32) -> (i32, i32) {
    %c0_i32 = arith.constant 0 : i32
    %c0_i32_0 = arith.constant 0 : i32
    %c0_i32_1 = arith.constant 0 : i32
    return %c0_i32, %c0_i32_0 : i32, i32
  }
  func.func @transform_3(%arg0: i32) -> (i32, i32) {
    %c0_i32 = arith.constant 0 : i32
    %c0_i32_0 = arith.constant 0 : i32
    %c0_i32_1 = arith.constant 0 : i32
    return %c0_i32, %c0_i32_0 : i32, i32
  }
  func.func @transform_4(%arg0: i32) -> (i32, i32) {
    %c0_i32 = arith.constant 0 : i32
    %c0_i32_0 = arith.constant 0 : i32
    %c0_i32_1 = arith.constant 0 : i32
    return %c0_i32, %c0_i32_0 : i32, i32
  }
  func.func @transform_5(%arg0: i32) -> (i32, i32) {
    %c0_i32 = arith.constant 0 : i32
    %c0_i32_0 = arith.constant 0 : i32
    return %c0_i32, %arg0 : i32, i32
  }
}

</mosaic_0001>

<bundles_post_ra>
// kernel: tpu_custom_call.1
= control target key start
LH: loop header
LB: loop body
LE: loop exit
PB: predicated region body
PF: predicated region fallthrough
CT: control target
= control target key end

     0   :  { %vm95_vm0 = vcmask 1044480   ;;  %vm46_vm1 = vcmask 105472   ;;  %s4346_s0 = inlined_call_operand.vmem [shape: f32[8,13], index: 0, kind: input, shape index: {}]   ;;  %s4347_s1 = inlined_call_operand.vmem [shape: f32[13,64], index: 1, kind: input, shape index: {}]   ;;  %s4348_s2 = inlined_call_operand.vmem [shape: f32[1,64], index: 2, kind: input, shape index: {}]   ;;  %s4349_s3 = inlined_call_operand.vmem [shape: f32[64,3], index: 3, kind: input, shape index: {}]   ;;  %s4350_s4 = inlined_call_operand.vmem [shape: f32[1,3], index: 4, kind: input, shape index: {}]   ;;  %s4351_s5 = inlined_call_operand.hbm [shape: f32[3,8], index: 5, kind: output, shape index: {}]  }
   0x1   :  { %v37_v0 = vld [vmem:[%s4347_s1] sm:$0xff]  ;;  %v38_v1 = vld [vmem:[%s4347_s1 + $0x8] sm:$0x1f]  ;;  %v23_v7 = vld [vmem:[%s4346_s0 + $0x10] sm:$0xff] }
   0x2   :  { %v21_v2 = vld [vmem:[%s4346_s0] sm:$0xff]  ;;  %v97_v3 = vsel %vm95_vm0, %v38_v1, 0  ;;  %v100_v4 = vand.u32 4294901760, %v37_v0  ;;  %v22_v6 = vld [vmem:[%s4346_s0 + $0x8] sm:$0xff]  ;;  %v24_v8 = vld [vmem:[%s4346_s0 + $0x18] sm:$0xff]  ;;  %v54_v12 = vsel %vm46_vm1, %v23_v7, 0 }
   0x3   :  { %v48_v5 = vsel %vm46_vm1, %v21_v2, 0  ;;  %v103_v9 = vand.u32 4294901760, %v97_v3  ;;  %v51_v11 = vsel %vm46_vm1, %v22_v6, 0  ;;  %v25_v13 = vld [vmem:[%s4346_s0 + $0x20] sm:$0xff]  ;;  %v3580_v16 = vand.u32 4294901760, %v54_v12  ;;  %v26_v22 = vld [vmem:[%s4346_s0 + $0x28] sm:$0xff] }
   0x4   :  { %v3569_v10 = vand.u32 4294901760, %v48_v5  ;;  %v3576_v14 = vand.u32 4294901760, %v51_v11  ;;  %v3578_v15 = vsub.f32 %v37_v0, %v100_v4  ;;  %v57_v17 = vsel %vm46_vm1, %v24_v8, 0 }
   0x5   :  { %v3583_v18 = vpack.c.bf16 %v103_v9, %v100_v4  ;;  %v3588_v20 = vsub.f32 %v97_v3, %v103_v9  ;;  %v3590_v21 = vand.u32 4294901760, %v57_v17  ;;  %v3600_v25 = vsub.f32 %v54_v12, %v3580_v16 }
   0x6   :  { %v3586_v19 = vsub.f32 %v48_v5, %v3569_v10  ;;  %v3596_v23 = vsub.f32 %v51_v11, %v3576_v14  ;;  %v329_v24 = vand.u32 4294901760, %v3578_v15  ;;  %v60_v26 = vsel %vm46_vm1, %v25_v13, 0 }
   0x7   :  { %3175 = vmatprep.subr.bf16.mxu0 %v3583_v18  ;;  %v336_v28 = vand.u32 4294901760, %v3588_v20  ;;  %v3607_v29 = vsub.f32 %v57_v17, %v3590_v21  ;;  %v3609_v30 = vand.u32 4294901760, %v60_v26 }
   0x8   :  { %v168_v27 = vand.u32 4294901760, %v3586_v19 }
   0x9   :  { %10 = vsyncpa [#allocation3], 0  ;;  %3177 = vmatpush3.bf16.msra.mxu0 %v3583_v18  ;;  %v178_v31 = vand.u32 4294901760, %v3596_v23  ;;  %v330_v32 = vsub.f32 %v3578_v15, %v329_v24  ;;  %v188_v33 = vand.u32 4294901760, %v3600_v25  ;;  %v63_v34 = vsel %vm46_vm1, %v26_v22, 0  ;;  %v27_v39 = vld [vmem:[%s4346_s0 + $0x30] sm:$0xff] }
   0xa   :  { %v169_v35 = vsub.f32 %v3586_v19, %v168_v27  ;;  %v337_v36 = vsub.f32 %v3588_v20, %v336_v28  ;;  %v198_v37 = vand.u32 4294901760, %v3607_v29  ;;  %v3626_v38 = vsub.f32 %v60_v26, %v3609_v30  ;;  %v28_v48 = vld [vmem:[%s4346_s0 + $0x38] sm:$0xff]  ;;  %v29_v49 = vld [vmem:[%s4346_s0 + $0x40] sm:$0xff]  ;;  %v30_v50 = vld [vmem:[%s4346_s0 + $0x48] sm:$0xff] }
   0xb   :  { %v179_v40 = vsub.f32 %v3596_v23, %v178_v31  ;;  %v331_v41 = vand.u32 4294901760, %v330_v32  ;;  %v189_v42 = vsub.f32 %v3600_v25, %v188_v33  ;;  %v3637_v43 = vand.u32 4294901760, %v63_v34  ;;  %v31_v59 = vld [vmem:[%s4346_s0 + $0x50] sm:$0xff]  ;;  %v32_v60 = vld [vmem:[%s4346_s0 + $0x58] sm:$0xff]  ;;  %v33_v5 = vld [vmem:[%s4346_s0 + $0x60] sm:$0xff] }
   0xc   :  { %v170_v44 = vand.u32 4294901760, %v169_v35  ;;  %v338_v45 = vand.u32 4294901760, %v337_v36  ;;  %v199_v46 = vsub.f32 %v3607_v29, %v198_v37  ;;  %v208_v47 = vand.u32 4294901760, %v3626_v38  ;;  %v34_v22 = vld [vmem:[%s4346_s0 + $0x68] sm:$0xff] }
   0xd   :  { %v180_v51 = vand.u32 4294901760, %v179_v40  ;;  %v190_v52 = vand.u32 4294901760, %v189_v42  ;;  %v3653_v53 = vsub.f32 %v63_v34, %v3637_v43  ;;  %v66_v54 = vsel %vm46_vm1, %v27_v39, 0 }
   0xe   :  { %2770 = vmatprep.mubr.f32.mxu0 %v170_v44  ;;  %v3178_v55 = vpack.c.bf16 %v338_v45, %v331_v41  ;;  %v200_v56 = vand.u32 4294901760, %v199_v46  ;;  %v209_v57 = vsub.f32 %v3626_v38, %v208_v47  ;;  %v3659_v58 = vand.u32 4294901760, %v66_v54 }
   0xf   :  { %2771 = vmatmul.mubr.f32.vlgmr.msra.gmra.mrb[0].mxu0 %v180_v51  ;;  %v218_v61 = vand.u32 4294901760, %v3653_v53  ;;  %v69_v62 = vsel %vm46_vm1, %v28_v48, 0  ;;  %v72_v63 = vsel %vm46_vm1, %v29_v49, 0  ;;  %v75_v0 = vsel %vm46_vm1, %v30_v50, 0  ;;  %v35_v48 = vld [vmem:[%s4346_s0 + $0x70] sm:$0xff] }
  0x10   :  { %3179 = vmatprep.subr.bf16.mxu0 %v3178_v55  ;;  %2773 = vmatprep.mubr.f32.mxu0 %v190_v52  ;;  %v210_v1 = vand.u32 4294901760, %v209_v57  ;;  %v3672_v2 = vsub.f32 %v66_v54, %v3659_v58  ;;  %v3674_v3 = vand.u32 4294901760, %v69_v62  ;;  %v3676_v4 = vand.u32 4294901760, %v72_v63 }
  0x11   :  { %3181 = vmatpush3.bf16.msra.mxu0 %v3178_v55  ;;  %v219_v6 = vsub.f32 %v3653_v53, %v218_v61  ;;  %v3684_v7 = vand.u32 4294901760, %v75_v0  ;;  %v78_v8 = vsel %vm46_vm1, %v31_v59, 0  ;;  %v81_v9 = vsel %vm46_vm1, %v32_v60, 0  ;;  %v36_v59 = vld [vmem:[%s4346_s0 + $0x78] sm:$0xff] }
  0x12   :  { %v228_v11 = vand.u32 4294901760, %v3672_v2  ;;  %v3690_v12 = vsub.f32 %v69_v62, %v3674_v3  ;;  %v3693_v13 = vsub.f32 %v72_v63, %v3676_v4  ;;  %v3695_v17 = vand.u32 4294901760, %v78_v8 }
  0x13   :  { %2774 = vmatmul.mubr.f32.gmra.mrb[2].mxu0 %v200_v56  ;;  %v220_v26 = vand.u32 4294901760, %v219_v6  ;;  %v3701_v32 = vsub.f32 %v75_v0, %v3684_v7  ;;  %v3703_v34 = vand.u32 4294901760, %v81_v9  ;;  %v84_v35 = vsel %vm46_vm1, %v33_v5, 0 }
  0x14   :  { %2776 = vmatprep.mubr.f32.mxu0 %v210_v1  ;;  %v229_v36 = vsub.f32 %v3672_v2, %v228_v11  ;;  %v238_v39 = vand.u32 4294901760, %v3690_v12  ;;  %v248_v40 = vand.u32 4294901760, %v3693_v13  ;;  %v3712_v41 = vsub.f32 %v78_v8, %v3695_v17 }
  0x15   :  { %v258_v42 = vand.u32 4294901760, %v3701_v32  ;;  %v3716_v44 = vsub.f32 %v81_v9, %v3703_v34  ;;  %v3718_v45 = vand.u32 4294901760, %v84_v35  ;;  %v87_v46 = vsel %vm46_vm1, %v34_v22, 0 }
  0x16   :  { %v230_v49 = vand.u32 4294901760, %v229_v36  ;;  %v239_v50 = vsub.f32 %v3690_v12, %v238_v39  ;;  %v249_v51 = vsub.f32 %v3693_v13, %v248_v40  ;;  %v268_v52 = vand.u32 4294901760, %v3712_v41 }
  0x17   :  { %2777 = vmatmul.mubr.f32.gmra.mrb[4].mxu0 %v220_v26  ;;  %v259_v54 = vsub.f32 %v3701_v32, %v258_v42  ;;  %v278_v55 = vand.u32 4294901760, %v3716_v44  ;;  %v3736_v56 = vsub.f32 %v84_v35, %v3718_v45  ;;  %v3738_v57 = vand.u32 4294901760, %v87_v46 }
  0x18   :  { %2779 = vmatprep.mubr.f32.mxu0 %v230_v49  ;;  %v240_v60 = vand.u32 4294901760, %v239_v50  ;;  %v250_v62 = vand.u32 4294901760, %v249_v51  ;;  %v269_v63 = vsub.f32 %v3712_v41, %v268_v52  ;;  %v90_v0 = vsel %vm46_vm1, %v35_v48, 0 }
  0x19   :  { %v288_v1 = vand.u32 4294901760, %v3736_v56  ;;  %v3749_v5 = vsub.f32 %v87_v46, %v3738_v57  ;;  %v3751_v6 = vand.u32 4294901760, %v90_v0  ;;  %v93_v8 = vsel %vm46_vm1, %v36_v59, 0 }
  0x1a   :  { %v3182_v9 = vpack.c.bf16 %v3588_v20, %v3578_v15  ;;  %v260_v22 = vand.u32 4294901760, %v259_v54  ;;  %v279_v26 = vsub.f32 %v3716_v44, %v278_v55  ;;  %v3760_v36 = vand.u32 4294901760, %v93_v8 }
  0x1b   :  { %2780 = vmatmul.mubr.f32.gmra.mrb[6].mxu0 %v240_v60  ;;  %v298_v35 = vand.u32 4294901760, %v3749_v5  ;;  %v270_v46 = vand.u32 4294901760, %v269_v63  ;;  %v289_v48 = vsub.f32 %v3736_v56, %v288_v1  ;;  %v3766_v49 = vsub.f32 %v90_v0, %v3751_v6 }
  0x1c   :  { %2782 = vmatprep.mubr.f32.mxu0 %v250_v62  ;;  %3183 = vmatprep.subr.bf16.mxu0 %v3182_v9  ;;  %v3190_v50 = vpack.c.bf16 %v336_v28, %v329_v24  ;;  %v3773_v51 = vsub.f32 %v93_v8, %v3760_v36  ;;  %v280_v59 = vand.u32 4294901760, %v279_v26  ;;  %vm1234_vm2 = vcmask 523264  }
  0x1d   :  { %v308_v54 = vand.u32 4294901760, %v3766_v49  ;;  %v299_v60 = vsub.f32 %v3749_v5, %v298_v35  ;;  %v290_v63 = vand.u32 4294901760, %v289_v48 }
  0x1e   :  { %v318_v62 = vand.u32 4294901760, %v3773_v51 }
  0x1f   :  { %2783 = vmatmul.mubr.f32.gmra.mrb[8].mxu0 %v260_v22  ;;  %v309_v15 = vsub.f32 %v3766_v49, %v308_v54  ;;  %v300_v20 = vand.u32 4294901760, %v299_v60 }
  0x20   :  { %2785 = vmatprep.mubr.f32.mxu0 %v270_v46  ;;  %v319_v24 = vsub.f32 %v3773_v51, %v318_v62 }
  0x21   :  { %v310_v28 = vand.u32 4294901760, %v309_v15 }
  0x22   :  { %v320_v0 = vand.u32 4294901760, %v319_v24 }
  0x23   :  { %2786 = vmatmul.mubr.f32.gmra.mrb[10].mxu0 %v280_v59 }
  0x24   :  { %2788 = vmatprep.mubr.f32.mxu0 %v290_v63 }
  0x27   :  { %2789 = vmatmul.mubr.f32.gmra.mrb[12].mxu0 %v300_v20  ;;  %v4010_v20 = vld [vmem:[%s4348_s2] ss:$0 sm:$0xff] }
  0x28   :  { %2791 = vmatprep.mubr.f32.mxu0 %v310_v28 }
  0x2b   :  { %2792 = vmatmul.mubr.f32.gmra.mrb[14].mxu0 %v320_v0 }
  0x2c   :  { %2798 = vmatprep.mubr.f32.mxu0 %v3569_v10 }
  0x2f   :  { %2799 = vmatmul.mubr.f32.vlgmr.msra.gmra.mrb[0].mxu0 %v3576_v14 }
  0x30   :  { %3185 = vmatpush3.bf16.msra.mxu0 %v3182_v9  ;;  %2801 = vmatprep.mubr.f32.mxu0 %v3580_v16 }
  0x31   :  { %3187 = vmatprep.subr.bf16.mxu0 %v3583_v18 }
  0x33   :  { %2802 = vmatmul.mubr.f32.gmra.mrb[2].mxu0 %v3590_v21 }
  0x34   :  { %2804 = vmatprep.mubr.f32.mxu0 %v3609_v30 }
  0x37   :  { %2805 = vmatmul.mubr.f32.gmra.mrb[4].mxu0 %v3637_v43 }
  0x38   :  { %2807 = vmatprep.mubr.f32.mxu0 %v3659_v58 }
  0x3b   :  { %2808 = vmatmul.mubr.f32.gmra.mrb[6].mxu0 %v3674_v3 }
  0x3c   :  { %2810 = vmatprep.mubr.f32.mxu0 %v3676_v4 }
  0x3f   :  { %2811 = vmatmul.mubr.f32.gmra.mrb[8].mxu0 %v3684_v7 }
  0x40   :  { %2813 = vmatprep.mubr.f32.mxu0 %v3695_v17 }
  0x43   :  { %2814 = vmatmul.mubr.f32.gmra.mrb[10].mxu0 %v3703_v34 }
  0x44   :  { %2816 = vmatprep.mubr.f32.mxu0 %v3718_v45 }
  0x47   :  { %2817 = vmatmul.mubr.f32.gmra.mrb[12].mxu0 %v3738_v57 }
  0x48   :  { %2819 = vmatprep.mubr.f32.mxu0 %v3751_v6 }
  0x4b   :  { %2820 = vmatmul.mubr.f32.gmra.mrb[14].mxu0 %v3760_v36 }
  0x4c   :  { %2826 = vmatprep.mubr.f32.mxu0 %v3586_v19 }
  0x4f   :  { %2827 = vmatmul.mubr.f32.vlgmr.msra.gmra.mrb[0].mxu0 %v3596_v23  ;;  %v1222_v23 = vld [vmem:[%s4349_s3 + $0x18] sm:$0xff] }
  0x50   :  { %3189 = vmatpush3.bf16.msra.mxu0 %v3583_v18  ;;  %2829 = vmatprep.mubr.f32.mxu0 %v3600_v25 }
  0x51   :  { %3191 = vmatprep.subr.bf16.mxu0 %v3190_v50 }
  0x53   :  { %2830 = vmatmul.mubr.f32.gmra.mrb[2].mxu0 %v3607_v29 }
  0x54   :  { %2832 = vmatprep.mubr.f32.mxu0 %v3626_v38 }
  0x57   :  { %2833 = vmatmul.mubr.f32.gmra.mrb[4].mxu0 %v3653_v53 }
  0x58   :  { %2835 = vmatprep.mubr.f32.mxu0 %v3672_v2 }
  0x5b   :  { %2836 = vmatmul.mubr.f32.gmra.mrb[6].mxu0 %v3690_v12 }
  0x5c   :  { %2838 = vmatprep.mubr.f32.mxu0 %v3693_v13 }
  0x5f   :  { %2839 = vmatmul.mubr.f32.gmra.mrb[8].mxu0 %v3701_v32 }
  0x60   :  { %2841 = vmatprep.mubr.f32.mxu0 %v3712_v41 }
  0x63   :  { %2842 = vmatmul.mubr.f32.gmra.mrb[10].mxu0 %v3716_v44 }
  0x64   :  { %2844 = vmatprep.mubr.f32.mxu0 %v3736_v56 }
  0x67   :  { %2845 = vmatmul.mubr.f32.gmra.mrb[12].mxu0 %v3749_v5 }
  0x68   :  { %2847 = vmatprep.mubr.f32.mxu0 %v3766_v49 }
  0x6b   :  { %2848 = vmatmul.mubr.f32.gmra.mrb[14].mxu0 %v3773_v51 }
  0x6c   :  { %2854 = vmatprep.mubr.f32.mxu0 %v168_v27  ;;  %v1293_v27 = vand.u32 4294901760, %v1222_v23 }
  0x6f   :  { %2855 = vmatmul.mubr.f32.vlgmr.msra.gmra.mrb[0].mxu0 %v178_v31  ;;  %v1224_v31 = vld [vmem:[%s4349_s3 + $0x28] sm:$0xff] }
  0x70   :  { %3193 = vmatpush3.bf16.msra.mxu0 %v3190_v50  ;;  %2857 = vmatprep.mubr.f32.mxu0 %v188_v33 }
  0x71   :  { %3195 = vmatprep.subr.bf16.mxu0 %v3583_v18 }
  0x73   :  { %2858 = vmatmul.mubr.f32.gmra.mrb[2].mxu0 %v198_v37  ;;  %v1299_v37 = vand.u32 4294901760, %v1224_v31 }
  0x74   :  { %2860 = vmatprep.mubr.f32.mxu0 %v208_v47  ;;  %v1226_v47 = vld [vmem:[%s4349_s3 + $0x38] sm:$0xff] }
  0x77   :  { %2861 = vmatmul.mubr.f32.gmra.mrb[4].mxu0 %v218_v61 }
  0x78   :  { %2863 = vmatprep.mubr.f32.mxu0 %v228_v11 }
  0x7b   :  { %2864 = vmatmul.mubr.f32.gmra.mrb[6].mxu0 %v238_v39 }
  0x7c   :  { %2866 = vmatprep.mubr.f32.mxu0 %v248_v40 }
  0x7f   :  { %2867 = vmatmul.mubr.f32.gmra.mrb[8].mxu0 %v258_v42 }
  0x80   :  { %2869 = vmatprep.mubr.f32.mxu0 %v268_v52  ;;  %v3962_v52 = vsub.f32 %v1224_v31, %v1299_v37 }
  0x83   :  { %2870 = vmatmul.mubr.f32.gmra.mrb[10].mxu0 %v278_v55 }
  0x84   :  { %2872 = vmatprep.mubr.f32.mxu0 %v288_v1  ;;  %v4357_v1 = vand.u32 4294901760, %v3962_v52 }
  0x86   :  { %v1555_v22 = vsub.f32 %v3962_v52, %v4357_v1 }
  0x87   :  { %2873 = vmatmul.mubr.f32.gmra.mrb[12].mxu0 %v298_v35 }
  0x88   :  { %2875 = vmatprep.mubr.f32.mxu0 %v308_v54  ;;  %v1556_v46 = vand.u32 4294901760, %v1555_v22 }
  0x8b   :  { %2876 = vmatmul.mubr.f32.gmra.mrb[14].mxu0 %v318_v62 }
  0x8c   :  { %2882 = vmatprep.mubr.f32.mxu0 %v3569_v10 }
  0x8f   :  { %2883 = vmatmul.mubr.f32.vlgmr.msra.gmra.mrb[0].mxu0 %v3576_v14 }
  0x90   :  { %3197 = vmatpush3.bf16.msra.mxu0 %v3583_v18  ;;  %2885 = vmatprep.mubr.f32.mxu0 %v3580_v16 }
  0x93   :  { %2886 = vmatmul.mubr.f32.gmra.mrb[2].mxu0 %v3590_v21 }
  0x94   :  { %2888 = vmatprep.mubr.f32.mxu0 %v3609_v30 }
  0x97   :  { %2889 = vmatmul.mubr.f32.gmra.mrb[4].mxu0 %v3637_v43 }
  0x98   :  { %2891 = vmatprep.mubr.f32.mxu0 %v3659_v58 }
  0x9b   :  { %2892 = vmatmul.mubr.f32.gmra.mrb[6].mxu0 %v3674_v3 }
  0x9c   :  { %2894 = vmatprep.mubr.f32.mxu0 %v3676_v4 }
  0x9f   :  { %2895 = vmatmul.mubr.f32.gmra.mrb[8].mxu0 %v3684_v7 }
  0xa0   :  { %2897 = vmatprep.mubr.f32.mxu0 %v3695_v17 }
  0xa3   :  { %2898 = vmatmul.mubr.f32.gmra.mrb[10].mxu0 %v3703_v34 }
  0xa4   :  { %2900 = vmatprep.mubr.f32.mxu0 %v3718_v45 }
  0xa7   :  { %2901 = vmatmul.mubr.f32.gmra.mrb[12].mxu0 %v3738_v57 }
  0xa8   :  { %2903 = vmatprep.mubr.f32.mxu0 %v3751_v6 }
  0xab   :  { %2904 = vmatmul.mubr.f32.gmra.mrb[14].mxu0 %v3760_v36 }
  0xac   :  { %2910 = vmatprep.mubr.f32.mxu0 %v3569_v10  ;;  %v1219_v10 = vld [vmem:[%s4349_s3] sm:$0xff] }
  0xaf   :  { %2911 = vmatmul.mubr.f32.vlgmr.msra.gmra.mrb[0].mxu0 %v3576_v14  ;;  %v1220_v14 = vld [vmem:[%s4349_s3 + $0x8] sm:$0xff] }
  0xb0   :  { %2913 = vmatprep.mubr.f32.mxu0 %v3580_v16  ;;  %v1284_v16 = vand.u32 4294901760, %v1219_v10  ;;  %v1287_v18 = vand.u32 4294901760, %v1220_v14 }
  0xb2   :  { %v3892_v19 = vpack.c.bf16 %v1287_v18, %v1284_v16  ;;  %v3934_v2 = vsub.f32 %v1219_v10, %v1284_v16 }
  0xb3   :  { %2914 = vmatmul.mubr.f32.gmra.mrb[2].mxu0 %v3590_v21  ;;  %v1221_v21 = vld [vmem:[%s4349_s3 + $0x10] sm:$0xff] }
  0xb4   :  { %2916 = vmatprep.mubr.f32.mxu0 %v3609_v30  ;;  %3199 = vmatprep.subr.bf16.mxu0 %v3892_v19  ;;  %v1290_v25 = vand.u32 4294901760, %v1221_v21  ;;  %v1223_v30 = vld [vmem:[%s4349_s3 + $0x20] sm:$0xff] }
  0xb5   :  { %3294 = vmatprep.subr.bf16.mxu1 %v3892_v19  ;;  %3201 = vmatpush3.bf16.msra.mxu0 %v3892_v19  ;;  %v1296_v33 = vand.u32 4294901760, %v1223_v30 }
  0xb6   :  { %3298 = vmatpush3.bf16.msra.mxu1 %v3892_v19  ;;  %v3904_v29 = vpack.c.bf16 %v1293_v27, %v1290_v25  ;;  %v3946_v13 = vsub.f32 %v1221_v21, %v1290_v25 }
  0xb7   :  { %2917 = vmatmul.mubr.f32.gmra.mrb[4].mxu0 %v3637_v43  ;;  %v3916_v38 = vpack.c.bf16 %v1299_v37, %v1296_v33  ;;  %v1225_v43 = vld [vmem:[%s4349_s3 + $0x30] sm:$0xff] }
  0xb8   :  { %2919 = vmatprep.mubr.f32.mxu0 %v3659_v58  ;;  %3203 = vmatprep.subr.bf16.mxu0 %v3904_v29  ;;  %v1302_v53 = vand.u32 4294901760, %v1225_v43  ;;  %v1305_v58 = vand.u32 4294901760, %v1226_v47  ;;  %v1533_v39 = vand.u32 4294901760, %v3946_v13 }
  0xb9   :  { %3295 = vmatprep.subr.bf16.mxu1 %v3904_v29  ;;  %3205 = vmatpush3.bf16.msra.mxu0 %v3904_v29 }
  0xba   :  { %3299 = vmatpush3.bf16.msra.mxu1 %v3904_v29  ;;  %3207 = vmatprep.subr.bf16.mxu0 %v3916_v38  ;;  %v3928_v61 = vpack.c.bf16 %v1305_v58, %v1302_v53  ;;  %v1534_v42 = vsub.f32 %v3946_v13, %v1533_v39  ;;  %v3972_v8 = vsub.f32 %v1225_v43, %v1302_v53 }
  0xbb   :  { %2920 = vmatmul.mubr.f32.gmra.mrb[6].mxu0 %v3674_v3  ;;  %3296 = vmatprep.subr.bf16.mxu1 %v3916_v38  ;;  %v3936_v3 = vsub.f32 %v1220_v14, %v1287_v18  ;;  %v3974_v9 = vsub.f32 %v1226_v47, %v1305_v58 }
  0xbc   :  { %2922 = vmatprep.mubr.f32.mxu0 %v3676_v4  ;;  %v1519_v4 = vand.u32 4294901760, %v3934_v2  ;;  %v1535_v55 = vand.u32 4294901760, %v1534_v42  ;;  %v4353_v35 = vand.u32 4294901760, %v3972_v8 }
  0xbd   :  { %3209 = vmatpush3.bf16.msra.mxu0 %v3916_v38  ;;  %v3993_v60 = vpack.c.bf16 %v3936_v3, %v3934_v2  ;;  %v4005_v15 = vpack.c.bf16 %v3974_v9, %v3972_v8 }
  0xbe   :  { %3300 = vmatpush3.bf16.msra.mxu1 %v3916_v38  ;;  %3211 = vmatprep.subr.bf16.mxu0 %v3928_v61  ;;  %v1520_v11 = vsub.f32 %v3934_v2, %v1519_v4  ;;  %v1562_v48 = vsub.f32 %v3972_v8, %v4353_v35 }
  0xbf   :  { %2923 = vmatmul.mubr.f32.gmra.mrb[8].mxu0 %v3684_v7  ;;  %3297 = vmatprep.subr.bf16.mxu1 %v3928_v61  ;;  %v1526_v7 = vand.u32 4294901760, %v3936_v3 }
  0xc0   :  { %2925 = vmatprep.mubr.f32.mxu0 %v3695_v17  ;;  %v3948_v17 = vsub.f32 %v1222_v23, %v1293_v27  ;;  %v1521_v32 = vand.u32 4294901760, %v1520_v11  ;;  %v1563_v51 = vand.u32 4294901760, %v1562_v48 }
  0xc1   :  { %3213 = vmatpush3.bf16.msra.mxu0 %v3928_v61  ;;  %v1527_v12 = vsub.f32 %v3936_v3, %v1526_v7 }
  0xc2   :  { %3301 = vmatpush3.bf16.msra.mxu1 %v3928_v61  ;;  %v4364_v40 = vand.u32 4294901760, %v3948_v17  ;;  %v3997_v62 = vpack.c.bf16 %v3948_v17, %v3946_v13  ;;  %v4369_v2 = vand.u32 4294901760, %v3948_v17 }
  0xc3   :  { %2926 = vmatmul.mubr.f32.gmra.mrb[10].mxu0 %v3703_v34  ;;  %v1528_v34 = vand.u32 4294901760, %v1527_v12 }
  0xc4   :  { %2928 = vmatprep.mubr.f32.mxu0 %v3718_v45  ;;  %v1541_v44 = vsub.f32 %v3948_v17, %v4364_v40  ;;  %v3960_v45 = vsub.f32 %v1223_v30, %v1296_v33  ;;  %v3266_v3 = vpack.c.bf16 %v4369_v2, %v1533_v39  ;;  %v4376_v17 = vand.u32 4294901760, %v3972_v8 }
  0xc5   :  { %v3952_v41 = vpack.c.bf16 %v1528_v34, %v1521_v32  ;;  %v4377_v39 = vand.u32 4294901760, %v3974_v9 }
  0xc6   :  { %v1542_v56 = vand.u32 4294901760, %v1541_v44  ;;  %v4001_v63 = vpack.c.bf16 %v3962_v52, %v3960_v45 }
  0xc7   :  { %2929 = vmatmul.mubr.f32.gmra.mrb[12].mxu0 %v3738_v57  ;;  %3215 = vmatprep.subr.bf16.mxu1 %v3952_v41  ;;  %v4359_v57 = vand.u32 4294901760, %v3960_v45 }
  0xc8   :  { %2931 = vmatprep.mubr.f32.mxu0 %v3751_v6  ;;  %v3967_v5 = vpack.c.bf16 %v1542_v56, %v1535_v55 }
  0xc9   :  { %v1548_v6 = vsub.f32 %v3960_v45, %v4359_v57 }
  0xcb   :  { %2932 = vmatmul.mubr.f32.gmra.mrb[14].mxu0 %v3760_v36  ;;  %v1549_v26 = vand.u32 4294901760, %v1548_v6  ;;  %v4352_v36 = vand.u32 4294901760, %v3974_v9 }
  0xcd   :  { %v1569_v49 = vsub.f32 %v3974_v9, %v4352_v36  ;;  %v3987_v50 = vpack.c.bf16 %v1556_v46, %v1549_v26 }
  0xcf   :  { %v1570_v54 = vand.u32 4294901760, %v1569_v49 }
  0xd1   :  { %v3989_v59 = vpack.c.bf16 %v1570_v54, %v1563_v51 }
 0x182   :  { %v2912_v24 = vpop.f32.mrb[0].mxu0 }
 0x183   :  { %v3302_v28 = vadd.f32 %v2912_v24, %v4010_v20  ;;  %v1109_v0 = vpop.f32.mrb[1].mxu0 }
 0x184   :  { %v3303_v10 = vadd.f32 %v4010_v20, %v1109_v0 }
 0x185   :  { %v1204_v14 = vmax.f32 %v3302_v28, 0.0 }
 0x186   :  { %v1203_v16 = vmax.f32 %v3303_v10, 0.0  ;;  %v2915_v18 = vpop.f32.mrb[2].mxu0 }
 0x187   :  { %v1239_v21 = vsel %vm1234_vm2, %v1204_v14, 0  ;;  %v3304_v23 = vadd.f32 %v2915_v18, %v4010_v20  ;;  %v1121_v25 = vpop.f32.mrb[3].mxu0 }
 0x188   :  { %v4016_v27 = vand.u32 4294901760, %v1239_v21  ;;  %v1236_v30 = vsel %vm1234_vm2, %v1203_v16, 0  ;;  %v3305_v31 = vadd.f32 %v4010_v20, %v1121_v25 }
 0x189   :  { %v4020_v33 = vand.u32 4294901760, %v1236_v30  ;;  %v1206_v37 = vmax.f32 %v3304_v23, 0.0 }
 0x18a   :  { %v4023_v43 = vsub.f32 %v1239_v21, %v4016_v27  ;;  %v1205_v47 = vmax.f32 %v3305_v31, 0.0  ;;  %v2918_v53 = vpop.f32.mrb[4].mxu0 }
 0x18b   :  { %v4026_v58 = vsub.f32 %v1236_v30, %v4020_v33  ;;  %v1245_v11 = vsel %vm1234_vm2, %v1206_v37, 0  ;;  %v3306_v12 = vadd.f32 %v2918_v53, %v4010_v20  ;;  %v1133_v32 = vpop.f32.mrb[5].mxu0 }
 0x18c   :  { %v4362_v34 = vand.u32 4294901760, %v4023_v43  ;;  %v4031_v42 = vand.u32 4294901760, %v1245_v11  ;;  %v1242_v44 = vsel %vm1234_vm2, %v1205_v47, 0  ;;  %v3307_v55 = vadd.f32 %v4010_v20, %v1133_v32 }
 0x18d   :  { %v4035_v56 = vand.u32 4294901760, %v1242_v44  ;;  %v1208_v6 = vmax.f32 %v3306_v12, 0.0  ;;  %v1358_v22 = vand.u32 4294901760, %v4026_v58 }
 0x18e   :  { %v1369_v26 = vsub.f32 %v4023_v43, %v4362_v34  ;;  %v4042_v46 = vsub.f32 %v1245_v11, %v4031_v42  ;;  %v1207_v48 = vmax.f32 %v3307_v55, 0.0  ;;  %v2921_v49 = vpop.f32.mrb[6].mxu0 }
 0x18f   :  { %v4045_v51 = vsub.f32 %v1242_v44, %v4035_v56  ;;  %v1251_v54 = vsel %vm1234_vm2, %v1208_v6, 0  ;;  %v3308_v24 = vadd.f32 %v2921_v49, %v4010_v20  ;;  %v1145_v28 = vpop.f32.mrb[7].mxu0  ;;  %v1359_v0 = vsub.f32 %v4026_v58, %v1358_v22 }
 0x190   :  { %v4052_v10 = vand.u32 4294901760, %v1251_v54  ;;  %v1248_v14 = vsel %vm1234_vm2, %v1207_v48, 0  ;;  %v3309_v16 = vadd.f32 %v4010_v20, %v1145_v28  ;;  %v1370_v30 = vand.u32 4294901760, %v1369_v26 }
 0x191   :  { %v4056_v18 = vand.u32 4294901760, %v1248_v14  ;;  %v1210_v21 = vmax.f32 %v3308_v24, 0.0  ;;  %v1360_v23 = vand.u32 4294901760, %v1359_v0  ;;  %v4360_v25 = vand.u32 4294901760, %v4045_v51 }
 0x192   :  { %v4060_v31 = vsub.f32 %v1251_v54, %v4052_v10  ;;  %v1209_v37 = vmax.f32 %v3309_v16, 0.0  ;;  %v2924_v47 = vpop.f32.mrb[8].mxu0  ;;  %v4355_v53 = vand.u32 4294901760, %v4042_v46 }
 0x193   :  { %v4064_v11 = vsub.f32 %v1248_v14, %v4056_v18  ;;  %v1257_v12 = vsel %vm1234_vm2, %v1210_v21, 0  ;;  %v3310_v32 = vadd.f32 %v2924_v47, %v4010_v20  ;;  %v1157_v44 = vpop.f32.mrb[9].mxu0  ;;  %2950 = vmatprep.mubr.f32.mxu0 %v1360_v23  ;;  %v1379_v55 = vsub.f32 %v4045_v51, %v4360_v25 }
 0x194   :  { %v4071_v6 = vand.u32 4294901760, %v1257_v12  ;;  %v1254_v26 = vsel %vm1234_vm2, %v1209_v37, 0  ;;  %v3311_v48 = vadd.f32 %v4010_v20, %v1157_v44  ;;  %2951 = vmatmul.mubr.f32.vlgmr.msra.gmra.mrb[16].mxu0 %v1370_v30  ;;  %v1389_v49 = vsub.f32 %v4042_v46, %v4355_v53 }
 0x195   :  { %v4078_v54 = vand.u32 4294901760, %v1254_v26  ;;  %v1212_v24 = vmax.f32 %v3310_v32, 0.0  ;;  %v1380_v28 = vand.u32 4294901760, %v1379_v55  ;;  %v4354_v0 = vand.u32 4294901760, %v4064_v11 }
 0x196   :  { %v4082_v14 = vsub.f32 %v1257_v12, %v4071_v6  ;;  %v1211_v16 = vmax.f32 %v3311_v48, 0.0  ;;  %v2927_v21 = vpop.f32.mrb[10].mxu0  ;;  %v1390_v23 = vand.u32 4294901760, %v1389_v49  ;;  %v4356_v37 = vand.u32 4294901760, %v4060_v31 }
 0x197   :  { %v4086_v30 = vsub.f32 %v1254_v26, %v4078_v54  ;;  %v1263_v47 = vsel %vm1234_vm2, %v1212_v24, 0  ;;  %v3312_v44 = vadd.f32 %v2927_v21, %v4010_v20  ;;  %v1169_v36 = vpop.f32.mrb[11].mxu0  ;;  %2953 = vmatprep.mubr.f32.mxu1 %v1380_v28  ;;  %v1399_v32 = vsub.f32 %v4064_v11, %v4354_v0 }
 0x198   :  { %v4093_v12 = vand.u32 4294901760, %v1263_v47  ;;  %v1260_v55 = vsel %vm1234_vm2, %v1211_v16, 0  ;;  %v3313_v48 = vadd.f32 %v4010_v20, %v1169_v36  ;;  %2954 = vmatmul.mubr.f32.vlgmr.msra.gmra.mrb[0].mxu1 %v1390_v23  ;;  %v1409_v26 = vsub.f32 %v4060_v31, %v4356_v37 }
 0x199   :  { %v4100_v49 = vand.u32 4294901760, %v1260_v55  ;;  %v1214_v24 = vmax.f32 %v3312_v44, 0.0  ;;  %3217 = vmatpush3.bf16.msra.mxu1 %v3952_v41  ;;  %v1400_v28 = vand.u32 4294901760, %v1399_v32  ;;  %v4358_v21 = vand.u32 4294901760, %v4086_v30 }
 0x19a   :  { %v4105_v35 = vsub.f32 %v1263_v47, %v4093_v12  ;;  %v1213_v0 = vmax.f32 %v3313_v48, 0.0  ;;  %v2930_v16 = vpop.f32.mrb[12].mxu0  ;;  %v1410_v53 = vand.u32 4294901760, %v1409_v26  ;;  %v4361_v36 = vand.u32 4294901760, %v4082_v14  ;;  %3219 = vmatprep.subr.bf16.mxu1 %v3967_v5 }
 0x19b   :  { %v4110_v23 = vsub.f32 %v1260_v55, %v4100_v49  ;;  %v1269_v44 = vsel %vm1234_vm2, %v1214_v24, 0  ;;  %v3314_v41 = vadd.f32 %v2930_v16, %v4010_v20  ;;  %v1181_v32 = vpop.f32.mrb[13].mxu0  ;;  %2956 = vmatprep.mubr.f32.mxu1 %v1400_v28  ;;  %v1419_v47 = vsub.f32 %v4086_v30, %v4358_v21 }
 0x19c   :  { %v4117_v48 = vand.u32 4294901760, %v1269_v44  ;;  %v1266_v26 = vsel %vm1234_vm2, %v1213_v0, 0  ;;  %v3315_v37 = vadd.f32 %v4010_v20, %v1181_v32  ;;  %2957 = vmatmul.mubr.f32.gmra.mrb[2].mxu1 %v1410_v53  ;;  %v1429_v55 = vsub.f32 %v4082_v14, %v4361_v36 }
 0x19d   :  { %v4124_v24 = vand.u32 4294901760, %v1266_v26  ;;  %v1216_v16 = vmax.f32 %v3314_v41, 0.0  ;;  %v1420_v1 = vand.u32 4294901760, %v1419_v47  ;;  %3221 = vmatpush3.bf16.msra.mxu1 %v3967_v5  ;;  %v4363_v28 = vand.u32 4294901760, %v4110_v23 }
 0x19e   :  { %v4129_v21 = vsub.f32 %v1269_v44, %v4117_v48  ;;  %v1215_v57 = vmax.f32 %v3315_v37, 0.0  ;;  %v2933_v0 = vpop.f32.mrb[14].mxu0  ;;  %v1430_v25 = vand.u32 4294901760, %v1429_v55  ;;  %v4368_v53 = vand.u32 4294901760, %v4105_v35  ;;  %3223 = vmatprep.subr.bf16.mxu1 %v3987_v50 }
 0x19f   :  { %v4134_v32 = vsub.f32 %v1266_v26, %v4124_v24  ;;  %v1275_v41 = vsel %vm1234_vm2, %v1216_v16, 0  ;;  %v3316_v47 = vadd.f32 %v2933_v0, %v4010_v20  ;;  %v1193_v5 = vpop.f32.mrb[15].mxu0  ;;  %2959 = vmatprep.mubr.f32.mxu1 %v1420_v1  ;;  %v1439_v44 = vsub.f32 %v4110_v23, %v4363_v28 }
 0x1a0   :  { %v4141_v37 = vand.u32 4294901760, %v1275_v41  ;;  %v1272_v55 = vsel %vm1234_vm2, %v1215_v57, 0  ;;  %v3317_v36 = vadd.f32 %v4010_v20, %v1193_v5  ;;  %2960 = vmatmul.mubr.f32.gmra.mrb[4].mxu1 %v1430_v25  ;;  %v1449_v26 = vsub.f32 %v4105_v35, %v4368_v53 }
 0x1a1   :  { %v4148_v16 = vand.u32 4294901760, %v1272_v55  ;;  %v1218_v0 = vmax.f32 %v3316_v47, 0.0  ;;  %v1440_v34 = vand.u32 4294901760, %v1439_v44  ;;  %v4365_v1 = vand.u32 4294901760, %v4134_v32  ;;  %3225 = vmatpush3.bf16.msra.mxu1 %v3987_v50 }
 0x1a2   :  { %v4153_v28 = vsub.f32 %v1275_v41, %v4141_v37  ;;  %v1217_v40 = vmax.f32 %v3317_v36, 0.0  ;;  %v1450_v57 = vand.u32 4294901760, %v1449_v26  ;;  %v4366_v20 = vand.u32 4294901760, %v4129_v21  ;;  %3227 = vmatprep.subr.bf16.mxu1 %v3989_v59 }
 0x1a3   :  { %v4158_v25 = vsub.f32 %v1272_v55, %v4148_v16  ;;  %v1281_v5 = vsel %vm1234_vm2, %v1218_v0, 0  ;;  %2962 = vmatprep.mubr.f32.mxu1 %v1440_v34  ;;  %v1459_v47 = vsub.f32 %v4134_v32, %v4365_v1  ;;  %v4375_v13 = vand.u32 4294901760, %v4064_v11 }
 0x1a4   :  { %v4164_v50 = vand.u32 4294901760, %v1281_v5  ;;  %v1278_v41 = vsel %vm1234_vm2, %v1217_v40, 0  ;;  %2963 = vmatmul.mubr.f32.gmra.mrb[6].mxu1 %v1450_v57  ;;  %v1469_v36 = vsub.f32 %v4129_v21, %v4366_v20  ;;  %v4367_v44 = vand.u32 4294901760, %v4153_v28 }
 0x1a5   :  { %v4171_v55 = vand.u32 4294901760, %v1278_v41  ;;  %v1460_v26 = vand.u32 4294901760, %v1459_v47  ;;  %v1478_v34 = vand.u32 4294901760, %v4158_v25  ;;  %3229 = vmatpush3.bf16.msra.mxu1 %v3989_v59  ;;  %v4382_v8 = vand.u32 4294901760, %v4105_v35 }
 0x1a6   :  { %v4176_v0 = vsub.f32 %v1281_v5, %v4164_v50  ;;  %v1470_v1 = vand.u32 4294901760, %v1469_v36  ;;  %v1489_v40 = vsub.f32 %v4153_v28, %v4367_v44  ;;  %3231 = vmatprep.subr.bf16.mxu1 %v3993_v60  ;;  %v4383_v9 = vand.u32 4294901760, %v4134_v32 }
 0x1a7   :  { %v4183_v57 = vsub.f32 %v1278_v41, %v4171_v55  ;;  %2965 = vmatprep.mubr.f32.mxu1 %v1460_v26  ;;  %v1479_v47 = vsub.f32 %v4158_v25, %v1478_v34 }
 0x1a8   :  { %2966 = vmatmul.mubr.f32.gmra.mrb[8].mxu1 %v1470_v1  ;;  %v1508_v59 = vand.u32 4294901760, %v4176_v0  ;;  %v1490_v20 = vand.u32 4294901760, %v1489_v40 }
 0x1a9   :  { %v1480_v5 = vand.u32 4294901760, %v1479_v47  ;;  %v1498_v36 = vand.u32 4294901760, %v4183_v57 }
 0x1aa   :  { %v1509_v44 = vsub.f32 %v4176_v0, %v1508_v59 }
 0x1ab   :  { %2968 = vmatprep.mubr.f32.mxu1 %v1480_v5  ;;  %v1499_v41 = vsub.f32 %v4183_v57, %v1498_v36 }
 0x1ac   :  { %2969 = vmatmul.mubr.f32.gmra.mrb[10].mxu1 %v1490_v20  ;;  %v1510_v53 = vand.u32 4294901760, %v1509_v44 }
 0x1ad   :  { %v1500_v26 = vand.u32 4294901760, %v1499_v41 }
 0x1af   :  { %2971 = vmatprep.mubr.f32.mxu1 %v1500_v26 }
 0x1b0   :  { %2972 = vmatmul.mubr.f32.gmra.mrb[12].mxu1 %v1510_v53 }
 0x1b1   :  { %2990 = vmatprep.mubr.f32.mxu1 %v4020_v33 }
 0x1b4   :  { %2991 = vmatmul.mubr.f32.vlgmr.msra.gmra.mrb[14].mxu1 %v4016_v27 }
 0x1b5   :  { %2993 = vmatprep.mubr.f32.mxu1 %v4035_v56  ;;  %3233 = vmatpush3.bf16.msra.mxu1 %v3993_v60  ;;  %v3262_v60 = vpack.c.bf16 %v1526_v7, %v1519_v4  ;;  %v4370_v4 = vand.u32 4294901760, %v4023_v43  ;;  %v4371_v7 = vand.u32 4294901760, %v4045_v51 }
 0x1b6   :  { %3235 = vmatprep.subr.bf16.mxu1 %v3997_v62 }
 0x1b8   :  { %2994 = vmatmul.mubr.f32.gmra.mrb[0].mxu1 %v4031_v42 }
 0x1b9   :  { %2996 = vmatprep.mubr.f32.mxu1 %v4056_v18  ;;  %3237 = vmatpush3.bf16.msra.mxu1 %v3997_v62  ;;  %v4372_v62 = vand.u32 4294901760, %v3960_v45  ;;  %v4379_v45 = vand.u32 4294901760, %v4086_v30 }
 0x1ba   :  { %3239 = vmatprep.subr.bf16.mxu1 %v4001_v63 }
 0x1bc   :  { %2997 = vmatmul.mubr.f32.gmra.mrb[2].mxu1 %v4052_v10 }
 0x1bd   :  { %2999 = vmatprep.mubr.f32.mxu1 %v4078_v54  ;;  %3241 = vmatpush3.bf16.msra.mxu1 %v4001_v63  ;;  %v4373_v63 = vand.u32 4294901760, %v3962_v52  ;;  %v4380_v52 = vand.u32 4294901760, %v4082_v14 }
 0x1be   :  { %3243 = vmatprep.subr.bf16.mxu1 %v4005_v15 }
 0x1c0   :  { %3000 = vmatmul.mubr.f32.gmra.mrb[4].mxu1 %v4071_v6 }
 0x1c1   :  { %3002 = vmatprep.mubr.f32.mxu1 %v4100_v49  ;;  %3245 = vmatpush3.bf16.msra.mxu1 %v4005_v15  ;;  %v3270_v15 = vpack.c.bf16 %v4373_v63, %v4372_v62 }
 0x1c2   :  { %3247 = vmatprep.subr.bf16.mxu1 %v3892_v19 }
 0x1c4   :  { %3003 = vmatmul.mubr.f32.gmra.mrb[6].mxu1 %v4093_v12 }
 0x1c5   :  { %3005 = vmatprep.mubr.f32.mxu1 %v4124_v24 }
 0x1c8   :  { %3006 = vmatmul.mubr.f32.gmra.mrb[8].mxu1 %v4117_v48 }
 0x1c9   :  { %3008 = vmatprep.mubr.f32.mxu1 %v4148_v16 }
 0x1cc   :  { %3009 = vmatmul.mubr.f32.gmra.mrb[10].mxu1 %v4141_v37 }
 0x1cd   :  { %3011 = vmatprep.mubr.f32.mxu1 %v4171_v55 }
 0x1d0   :  { %3012 = vmatmul.mubr.f32.gmra.mrb[12].mxu1 %v4164_v50 }
 0x1d1   :  { %3030 = vmatprep.mubr.f32.mxu1 %v4026_v58  ;;  %v4374_v58 = vand.u32 4294901760, %v4042_v46 }
 0x1d4   :  { %3031 = vmatmul.mubr.f32.vlgmr.msra.gmra.mrb[14].mxu1 %v4023_v43  ;;  %v3274_v43 = vpack.c.bf16 %v4377_v39, %v4376_v17 }
 0x1d5   :  { %3033 = vmatprep.mubr.f32.mxu1 %v4045_v51  ;;  %3249 = vmatpush3.bf16.msra.mxu1 %v3892_v19  ;;  %v4384_v51 = vand.u32 4294901760, %v4129_v21 }
 0x1d6   :  { %3251 = vmatprep.subr.bf16.mxu1 %v3904_v29 }
 0x1d8   :  { %3034 = vmatmul.mubr.f32.gmra.mrb[0].mxu1 %v4042_v46  ;;  %v4381_v46 = vand.u32 4294901760, %v4110_v23 }
 0x1d9   :  { %3036 = vmatprep.mubr.f32.mxu1 %v4064_v11  ;;  %3253 = vmatpush3.bf16.msra.mxu1 %v3904_v29 }
 0x1da   :  { %3255 = vmatprep.subr.bf16.mxu1 %v3916_v38 }
 0x1dc   :  { %3037 = vmatmul.mubr.f32.gmra.mrb[2].mxu1 %v4060_v31 }
 0x1dd   :  { %3039 = vmatprep.mubr.f32.mxu1 %v4086_v30  ;;  %3257 = vmatpush3.bf16.msra.mxu1 %v3916_v38 }
 0x1de   :  { %3259 = vmatprep.subr.bf16.mxu1 %v3928_v61 }
 0x1e0   :  { %3040 = vmatmul.mubr.f32.gmra.mrb[4].mxu1 %v4082_v14 }
 0x1e1   :  { %3042 = vmatprep.mubr.f32.mxu1 %v4110_v23  ;;  %3261 = vmatpush3.bf16.msra.mxu1 %v3928_v61 }
 0x1e2   :  { %3263 = vmatprep.subr.bf16.mxu1 %v3262_v60 }
 0x1e4   :  { %3043 = vmatmul.mubr.f32.gmra.mrb[6].mxu1 %v4105_v35 }
 0x1e5   :  { %3045 = vmatprep.mubr.f32.mxu1 %v4134_v32 }
 0x1e8   :  { %3046 = vmatmul.mubr.f32.gmra.mrb[8].mxu1 %v4129_v21 }
 0x1e9   :  { %3048 = vmatprep.mubr.f32.mxu1 %v4158_v25 }
 0x1ec   :  { %3049 = vmatmul.mubr.f32.gmra.mrb[10].mxu1 %v4153_v28 }
 0x1ed   :  { %3051 = vmatprep.mubr.f32.mxu1 %v4183_v57 }
 0x1f0   :  { %3052 = vmatmul.mubr.f32.gmra.mrb[12].mxu1 %v4176_v0 }
 0x1f1   :  { %3070 = vmatprep.mubr.f32.mxu1 %v1358_v22  ;;  %v4378_v22 = vand.u32 4294901760, %v4060_v31  ;;  %v4385_v31 = vand.u32 4294901760, %v4153_v28 }
 0x1f4   :  { %3071 = vmatmul.mubr.f32.vlgmr.msra.gmra.mrb[14].mxu1 %v4370_v4 }
 0x1f5   :  { %3073 = vmatprep.mubr.f32.mxu1 %v4371_v7  ;;  %3265 = vmatpush3.bf16.msra.mxu1 %v3262_v60 }
 0x1f6   :  { %3267 = vmatprep.subr.bf16.mxu1 %v3266_v3 }
 0x1f8   :  { %3074 = vmatmul.mubr.f32.gmra.mrb[0].mxu1 %v4374_v58 }
 0x1f9   :  { %3076 = vmatprep.mubr.f32.mxu1 %v4375_v13  ;;  %3269 = vmatpush3.bf16.msra.mxu1 %v3266_v3 }
 0x1fa   :  { %3271 = vmatprep.subr.bf16.mxu1 %v3270_v15 }
 0x1fc   :  { %3077 = vmatmul.mubr.f32.gmra.mrb[2].mxu1 %v4378_v22 }
 0x1fd   :  { %3079 = vmatprep.mubr.f32.mxu1 %v4379_v45  ;;  %3273 = vmatpush3.bf16.msra.mxu1 %v3270_v15 }
 0x1fe   :  { %3275 = vmatprep.subr.bf16.mxu1 %v3274_v43 }
 0x200   :  { %3080 = vmatmul.mubr.f32.gmra.mrb[4].mxu1 %v4380_v52 }
 0x201   :  { %3082 = vmatprep.mubr.f32.mxu1 %v4381_v46  ;;  %3277 = vmatpush3.bf16.msra.mxu1 %v3274_v43 }
 0x202   :  { %3279 = vmatprep.subr.bf16.mxu1 %v3892_v19 }
 0x204   :  { %3083 = vmatmul.mubr.f32.gmra.mrb[6].mxu1 %v4382_v8 }
 0x205   :  { %3085 = vmatprep.mubr.f32.mxu1 %v4383_v9 }
 0x208   :  { %3086 = vmatmul.mubr.f32.gmra.mrb[8].mxu1 %v4384_v51 }
 0x209   :  { %3088 = vmatprep.mubr.f32.mxu1 %v1478_v34 }
 0x20c   :  { %3089 = vmatmul.mubr.f32.gmra.mrb[10].mxu1 %v4385_v31 }
 0x20d   :  { %3091 = vmatprep.mubr.f32.mxu1 %v1498_v36 }
 0x210   :  { %3092 = vmatmul.mubr.f32.gmra.mrb[12].mxu1 %v1508_v59 }
 0x211   :  { %3110 = vmatprep.mubr.f32.mxu1 %v4020_v33 }
 0x214   :  { %3111 = vmatmul.mubr.f32.vlgmr.msra.gmra.mrb[14].mxu1 %v4016_v27 }
 0x215   :  { %3113 = vmatprep.mubr.f32.mxu1 %v4035_v56  ;;  %3281 = vmatpush3.bf16.msra.mxu1 %v3892_v19 }
 0x216   :  { %3283 = vmatprep.subr.bf16.mxu1 %v3904_v29 }
 0x218   :  { %3114 = vmatmul.mubr.f32.gmra.mrb[0].mxu1 %v4031_v42 }
 0x219   :  { %3116 = vmatprep.mubr.f32.mxu1 %v4056_v18  ;;  %3285 = vmatpush3.bf16.msra.mxu1 %v3904_v29 }
 0x21a   :  { %3287 = vmatprep.subr.bf16.mxu1 %v3916_v38 }
 0x21c   :  { %3117 = vmatmul.mubr.f32.gmra.mrb[2].mxu1 %v4052_v10 }
 0x21d   :  { %3119 = vmatprep.mubr.f32.mxu1 %v4078_v54  ;;  %3289 = vmatpush3.bf16.msra.mxu1 %v3916_v38  ;;  %v2513_v38 = vld [vmem:[%s4350_s4] ss:$0 sm:$0xff]  ;;  %s3519_s4 = smov [#allocation2]  }
 0x21e   :  { %3291 = vmatprep.subr.bf16.mxu1 %v3928_v61  ;;  %s2504_s19 = sshll.u32 %s3519_s4, 4  ;;  %s2505_s19 = int_to_ptr.vmem [resolvable:$true] %s2504_s19 }
 0x21f   :  { %s3495_s20 = scalar_lea.vmem %s2505_s19, 64  ;;  %p3500_p1 = scmp.lt.s32.totalorder %s2505_s19, %s2505_s19 }
 0x220   :  { %3120 = vmatmul.mubr.f32.gmra.mrb[4].mxu1 %v4071_v6  ;;  %p3496_p0 = scmp.ne.s32.totalorder %s2505_s19, %s3495_s20  ;;  %p3501_p2 = scmp.lt.s32.totalorder %s3495_s20, %s3495_s20 }
 0x221   :  { %3122 = vmatprep.mubr.f32.mxu1 %v4100_v49  ;;  %3293 = vmatpush3.bf16.msra.mxu1 %v3928_v61 }
 0x222   :  { %p3502_p3 = por %p3501_p2, %p3500_p1 }
 0x224   :  { %3123 = vmatmul.mubr.f32.gmra.mrb[6].mxu1 %v4093_v12  ;;  %p3503_p4 = pnand %p3502_p3, %p3496_p0 }
 0x225   :  { %3125 = vmatprep.mubr.f32.mxu1 %v4124_v24 }
 0x228   :  { %3126 = vmatmul.mubr.f32.gmra.mrb[8].mxu1 %v4117_v48 }
 0x229   :  { %3128 = vmatprep.mubr.f32.mxu1 %v4148_v16 }
 0x22c   :  { %3129 = vmatmul.mubr.f32.gmra.mrb[10].mxu1 %v4141_v37 }
 0x22d   :  { %3131 = vmatprep.mubr.f32.mxu1 %v4171_v55 }
 0x230   :  { %3132 = vmatmul.mubr.f32.gmra.mrb[12].mxu1 %v4164_v50 }
 0x231   :  { %3150 = vmatprep.mubr.f32.mxu1 %v4020_v33 }
 0x234   :  { %3151 = vmatmul.mubr.f32.vlgmr.msra.gmra.mrb[14].mxu1 %v4016_v27 }
 0x235   :  { %3153 = vmatprep.mubr.f32.mxu1 %v4035_v56 }
 0x238   :  { %3154 = vmatmul.mubr.f32.gmra.mrb[0].mxu1 %v4031_v42 }
 0x239   :  { %3156 = vmatprep.mubr.f32.mxu1 %v4056_v18 }
 0x23c   :  { %3157 = vmatmul.mubr.f32.gmra.mrb[2].mxu1 %v4052_v10 }
 0x23d   :  { %3159 = vmatprep.mubr.f32.mxu1 %v4078_v54 }
 0x240   :  { %3160 = vmatmul.mubr.f32.gmra.mrb[4].mxu1 %v4071_v6 }
 0x241   :  { %3162 = vmatprep.mubr.f32.mxu1 %v4100_v49 }
 0x244   :  { %3163 = vmatmul.mubr.f32.gmra.mrb[6].mxu1 %v4093_v12 }
 0x245   :  { %3165 = vmatprep.mubr.f32.mxu1 %v4124_v24 }
 0x248   :  { %3166 = vmatmul.mubr.f32.gmra.mrb[8].mxu1 %v4117_v48 }
 0x249   :  { %3168 = vmatprep.mubr.f32.mxu1 %v4148_v16 }
 0x24c   :  { %3169 = vmatmul.mubr.f32.gmra.mrb[10].mxu1 %v4141_v37 }
 0x24d   :  { %3171 = vmatprep.mubr.f32.mxu1 %v4171_v55 }
 0x250   :  { %3172 = vmatmul.mubr.f32.gmra.mrb[12].mxu1 %v4164_v50 }
 0x267   :  { %v2952_v19 = vpop.f32.mrb[16].mxu0 }
 0x268   :  { %v1362_v29 = vpop.f32.mrb[17].mxu0  ;;  %v1373_v61 = vadd.f32 %v2952_v19, %v2513_v38 }
 0x269   :  { %v1363_v35 = vadd.f32 %v2513_v38, %v1362_v29 }
 0x307   :  { %v3152_v27 = vpop.f32.mrb[14].mxu1 }
 0x308   :  { %v3319_v33 = vadd.f32 %v3152_v27, %v1373_v61  ;;  %v2371_v42 = vpop.f32.mrb[15].mxu1 }
 0x309   :  { %v3321_v56 = vadd.f32 %v2371_v42, %v1363_v35 }
 0x30b   :  { %v3155_v10 = vpop.f32.mrb[0].mxu1  ;;  %2465 = vxpose.xlu0.b32.start [1/16] (narrow) %v3321_v56, 8 }
 0x30c   :  { %v2383_v18 = vpop.f32.mrb[1].mxu1  ;;  %v3322_v12 = vadd.f32 %v3155_v10, %v2513_v38 }
 0x30d   :  { %v3323_v54 = vadd.f32 %v2513_v38, %v2383_v18 }
 0x30f   :  { %v3158_v11 = vpop.f32.mrb[2].mxu1  ;;  %2466 = vxpose.xlu0.b32.cont [2/16] (narrow) %v3319_v33, 8 }
 0x310   :  { %v2395_v6 = vpop.f32.mrb[3].mxu1  ;;  %v3324_v28 = vadd.f32 %v3158_v11, %v2513_v38 }
 0x311   :  { %v3325_v23 = vadd.f32 %v2513_v38, %v2395_v6 }
 0x313   :  { %v3161_v14 = vpop.f32.mrb[4].mxu1  ;;  %2467 = vxpose.xlu0.b32.cont [3/16] (narrow) %v3323_v54, 8 }
 0x314   :  { %v2407_v30 = vpop.f32.mrb[5].mxu1  ;;  %v3326_v20 = vadd.f32 %v3161_v14, %v2513_v38 }
 0x315   :  { %v3327_v37 = vadd.f32 %v2513_v38, %v2407_v30 }
 0x317   :  { %v3164_v49 = vpop.f32.mrb[6].mxu1  ;;  %2468 = vxpose.xlu0.b32.cont [4/16] (narrow) %v3322_v12, 8 }
 0x318   :  { %v2419_v21 = vpop.f32.mrb[7].mxu1  ;;  %v3328_v50 = vadd.f32 %v3164_v49, %v2513_v38 }
 0x319   :  { %v3329_v25 = vadd.f32 %v2513_v38, %v2419_v21 }
 0x31b   :  { %v3167_v48 = vpop.f32.mrb[8].mxu1  ;;  %2469 = vxpose.xlu0.b32.cont [5/16] (narrow) %v3325_v23, 8 }
 0x31c   :  { %v2431_v24 = vpop.f32.mrb[9].mxu1  ;;  %v3330_v55 = vadd.f32 %v3167_v48, %v2513_v38 }
 0x31d   :  { %v3331_v44 = vadd.f32 %v2513_v38, %v2431_v24 }
 0x31f   :  { %v3170_v53 = vpop.f32.mrb[10].mxu1  ;;  %2470 = vxpose.xlu0.b32.cont [6/16] (narrow) %v3324_v28, 8 }
 0x320   :  { %v2443_v32 = vpop.f32.mrb[11].mxu1  ;;  %v3332_v0 = vadd.f32 %v3170_v53, %v2513_v38 }
 0x321   :  { %v3333_v34 = vadd.f32 %v2513_v38, %v2443_v32 }
 0x323   :  { %v3173_v16 = vpop.f32.mrb[12].mxu1  ;;  %2471 = vxpose.xlu0.b32.cont [7/16] (narrow) %v3327_v37, 8 }
 0x324   :  { %v2455_v1 = vpop.f32.mrb[13].mxu1  ;;  %v3334_v57 = vadd.f32 %v3173_v16, %v2513_v38 }
 0x325   :  { %v3335_v40 = vadd.f32 %v2513_v38, %v2455_v1 }
 0x327   :  { %2472 = vxpose.xlu0.b32.cont [8/16] (narrow) %v3326_v20, 8 }
 0x32b   :  { %2473 = vxpose.xlu0.b32.cont [9/16] (narrow) %v3329_v25, 8 }
 0x32f   :  { %2474 = vxpose.xlu0.b32.cont [10/16] (narrow) %v3328_v50, 8 }
 0x333   :  { %2475 = vxpose.xlu0.b32.cont [11/16] (narrow) %v3331_v44, 8 }
 0x337   :  { %2476 = vxpose.xlu0.b32.cont [12/16] (narrow) %v3330_v55, 8 }
 0x33b   :  { %2477 = vxpose.xlu0.b32.cont [13/16] (narrow) %v3333_v34, 8 }
 0x33f   :  { %2478 = vxpose.xlu0.b32.cont [14/16] (narrow) %v3332_v0, 8 }
 0x343   :  { %2479 = vxpose.xlu0.b32.cont [15/16] (narrow) %v3335_v40, 8 }
 0x347   :  { %2480 = vxpose.xlu0.b32.end [16/16] (narrow) %v3334_v57, 8 }
 0x38b   :  { %v2481_v47 = vpop.trf.xlu0 }
 0x38c   :  { %2497 = vst [vmem:[#allocation2] sm:$0x7] %v2481_v47 }
 0x38d   :  { %3506 = shalt.err (!%p3503_p4)
}
 0x38e   :  { %s3507_s23 = scalar_lea.hbm %s4351_s5, 64 }
 0x38f   :  { %p3508_p5 = scmp.ne.s32.totalorder %s4351_s5, %s3507_s23  ;;  %p3511_p6 = scmp.lt.u32.totalorder %s3507_s23, %s4351_s5 }
 0x391   :  { %p3513_p7 = pnand %p3511_p6, %p3508_p5 }
 0x393   :  { %3516 = shalt.err (!%p3513_p7)
}
 0x394   :  { %2507 = dma.vmem_to_hbm [thread:$0]  %s2505_s19, 64, %s4351_s5, [#allocation3]  }
 0x395   :  { %3517 = dma.done.wait [#allocation3], 64  }
 0x396   :  { %3518 = vsyncadd [#allocation3], 4294967232 }
 0x397   :  { %2511 = vsyncpa [#allocation3], 1 }

</bundles_post_ra>
